<compile_context>
chip_gen: v5e
topology: v5e:2x2
jax: 0.10.0
libtpu: 0.0.40
codegen_flags: <defaults>
</compile_context>

<pallas_src>
import functools
import math

import jax
import jax.numpy as jnp
from jax.experimental import pallas as pl
from jax.experimental.pallas import tpu as pltpu


def _encoder_layer_kernel(x_ref, mask_ref,
                          wqkv_ref, bqkv_ref, wo_ref, bo_ref,
                          gamma_ref, beta_ref,
                          w1_ref, b1_ref, w2_ref, b2_ref,
                          out_ref, attn_ref,
                          *, n_heads, d_k, b_blk, seq, mm_dtype):
    H, dk, Bb, S = n_heads, d_k, b_blk, seq
    N = Bb * S                      # rows processed this grid step
    G = H * Bb                      # (head, batch) pairs
    cdt = mm_dtype                  # matmul operand dtype (f32 or bf16)

    x2 = x_ref[...]                 # (N, D) -- batch flattened into M
    D = x2.shape[-1]

    # ---- fused per-head QKV projection: one head-batched matmul with 3*dk
    # output lanes per head; 1/sqrt(d_k) already folded into the Q columns.
    xb = jnp.broadcast_to(x2[None], (H, N, D))            # consumed once
    qkv = jnp.einsum("hnd,hde->hne", xb.astype(cdt), wqkv_ref[...].astype(cdt),
                     preferred_element_type=jnp.float32) + bqkv_ref[...]
    q = qkv[:, :, 0:dk]
    k = qkv[:, :, dk:2 * dk]
    v = qkv[:, :, 2 * dk:3 * dk]

    # (H, Bb*S, dk) -> (H*Bb, S, dk): leading-dim split/merge only (S is a
    # whole sublane tile), so no relayout.
    qg = q.reshape(G, S, dk)
    kg = k.reshape(G, S, dk)
    vg = v.reshape(G, S, dk)

    # ---- scaled dot-product attention for all (head, batch) pairs at once ----
    scores = jnp.einsum("gqd,gkd->gqk", qg.astype(cdt), kg.astype(cdt),
                        preferred_element_type=jnp.float32)          # (G, S, S)
    s4 = scores.reshape(H, Bb, S, S)
    maskb = mask_ref[...] > 0.0                          # compare once per block
    s4 = jnp.where(maskb[None], jnp.float32(-1e9), s4)   # exact masked_fill

    m = jnp.max(s4, axis=-1, keepdims=True)
    e = jnp.exp(s4 - m)
    ssum = jnp.sum(e, axis=-1, keepdims=True)
    r = pl.reciprocal(ssum, approx=True)                 # EUP vrcp slot
    r = r * (2.0 - ssum * r)                             # one NR step -> ~exact
    attn4 = e * r                                        # (H, Bb, S, S)

    # ---- store attn directly in (B, H, S, S): per-batch leading-dim reorder,
    # no wrapper-side HBM transpose round trip of the largest output.
    for i in range(Bb):                                  # static, small
        attn_ref[i] = attn4[:, i]
    # TODO(synk): for S < 128 these stores are lane-masked; pack/pad the last
    #             dim to a 128-multiple (or store bf16) for production S.

    ctx = jnp.einsum("gqk,gkd->gqd",
                     attn4.reshape(G, S, S).astype(cdt), vg.astype(cdt),
                     preferred_element_type=jnp.float32)             # (G, S, dk)
    ctx3 = ctx.reshape(H, N, dk)                         # leading merge only

    # ---- output projection + residual: accumulate heads into one (N, D)
    # value -- avoids materializing an (H, N, D) f32 intermediate and a VPU
    # head-reduction.  (Mosaic dot_general does not lower "hnk,hkd->nd".)
    proj = x2 + bo_ref[...]
    for h in range(H):                                   # static unroll
        proj = proj + jnp.dot(ctx3[h].astype(cdt), wo_ref[h].astype(cdt),
                              preferred_element_type=jnp.float32)

    mu = jnp.mean(proj, axis=-1, keepdims=True)
    var = jnp.mean((proj - mu) ** 2, axis=-1, keepdims=True)
    ln = (proj - mu) * jax.lax.rsqrt(var + 1e-5) * gamma_ref[...] + beta_ref[...]

    # ---- position-wise feed-forward: fc2(gelu(fc1(x))), exact (erf) gelu ----
    h1 = jnp.dot(ln.astype(cdt), w1_ref[...].astype(cdt),
                 preferred_element_type=jnp.float32) + b1_ref[...]
    h1 = 0.5 * h1 * (1.0 + jax.lax.erf(h1 * jnp.float32(1.0 / math.sqrt(2.0))))
    out = jnp.dot(h1.astype(cdt), w2_ref[...].astype(cdt),
                  preferred_element_type=jnp.float32) + b2_ref[...]
    out_ref[...] = out
    # TODO(synk): at realistic D/d_ff, tile d_ff on an extra "arbitrary" grid
    #             axis (accumulator scratch) and split attention over head
    #             groups to bound live ranges; unnecessary at test shapes.


def _vmem_capacity_bytes():
    """Best-effort physical VMEM query with a conservative (v7x) fallback."""
    try:
        info = pltpu.get_tpu_info()
        for attr in ("vmem_capacity_bytes", "vmem_bytes", "vmem_size_bytes"):
            val = getattr(info, attr, None)
            if val:
                return int(val)
    except Exception:
        pass
    return 64 * 1024 * 1024


def encoder_layer(x, mask_f, params, *, n_heads, d_k,
                  batch_block=None, use_bf16_matmul=False):
    B, S, D = x.shape
    H = n_heads

    vmem_cap = _vmem_capacity_bytes()
    # Generation-aware scoped-VMEM limit: leave headroom on 64 MiB parts (v7x),
    # use most of the 128 MiB on v5e/v6e.
    vmem_limit = int(max(32 << 20, min(vmem_cap - (16 << 20), 100 << 20)))

    # Batch rows packed per grid step (flattened into the matmul M dimension).
    if batch_block is None:
        rows_target = 512 if vmem_cap >= (96 << 20) else 256
        batch_block = 1
        for cand in range(1, B + 1):
            if B % cand != 0 or cand * S > rows_target:
                continue
            if B >= 2 and B // cand < 2:
                continue                 # keep >=2 grid steps (v7x has 2 TCs)
            batch_block = cand
    assert B % batch_block == 0
    Bb = batch_block
    grid = (B // Bb,)
    N = Bb * S

    # ---- wrapper-side layout plumbing (free XLA reshapes / constant folds) ----
    x2 = x.reshape(B * S, D)
    inv_scale = jnp.float32(1.0 / math.sqrt(float(d_k)))
    wq_h = params["wq"].reshape(D, H, d_k).transpose(1, 0, 2) * inv_scale
    wk_h = params["wk"].reshape(D, H, d_k).transpose(1, 0, 2)
    wv_h = params["wv"].reshape(D, H, d_k).transpose(1, 0, 2)
    wqkv_h = jnp.concatenate([wq_h, wk_h, wv_h], axis=-1)      # (H, D, 3*dk)
    bq_h = params["bq"].reshape(H, 1, d_k) * inv_scale
    bk_h = params["bk"].reshape(H, 1, d_k)
    bv_h = params["bv"].reshape(H, 1, d_k)
    bqkv_h = jnp.concatenate([bq_h, bk_h, bv_h], axis=-1)      # (H, 1, 3*dk)
    wo_h = params["wo"].reshape(H, d_k, D)                     # (H, dk, D)

    weights = [wqkv_h, bqkv_h, wo_h,
               params["bo"], params["gamma"], params["beta"],
               params["w1"], params["b1"], params["w2"], params["b2"]]

    # TODO(synk): constant-index weight specs could use pipeline_mode=
    #             pl.Buffered(1) to halve their VMEM footprint.
    def _full_spec(arr):
        nd = arr.ndim
        return pl.BlockSpec(arr.shape, lambda b, _nd=nd: (0,) * _nd)

    in_specs = [
        pl.BlockSpec((N, D), lambda b: (b, 0)),                # x rows
        pl.BlockSpec((Bb, S, S), lambda b: (b, 0, 0)),         # attention mask
    ] + [_full_spec(w) for w in weights]

    out_specs = [
        pl.BlockSpec((N, D), lambda b: (b, 0)),                # encoder out rows
        pl.BlockSpec((Bb, H, S, S), lambda b: (b, 0, 0, 0)),   # attn, B-major
    ]

    mm_dtype = jnp.bfloat16 if use_bf16_matmul else jnp.float32
    kernel = functools.partial(_encoder_layer_kernel, n_heads=H, d_k=d_k,
                               b_blk=Bb, seq=S, mm_dtype=mm_dtype)

    out_flat, attn = pl.pallas_call(
        kernel,
        out_shape=(
            jax.ShapeDtypeStruct((B * S, D), jnp.float32),
            jax.ShapeDtypeStruct((B, H, S, S), jnp.float32),
        ),
        grid_spec=pltpu.PrefetchScalarGridSpec(
            num_scalar_prefetch=0,
            grid=grid,
            in_specs=in_specs,
            out_specs=out_specs,
        ),
        compiler_params=pltpu.CompilerParams(
            dimension_semantics=("parallel",),
            vmem_limit_bytes=vmem_limit,
        ),
    )(x2, mask_f, *weights)

    return out_flat.reshape(B, S, D), attn


def _reference(x, mask_f, params, *, n_heads, d_k):
    """Pure-JAX reference mirroring the PyTorch forward."""
    B, S, D = x.shape
    q = x @ params["wq"] + params["bq"][0]
    k = x @ params["wk"] + params["bk"][0]
    v = x @ params["wv"] + params["bv"][0]
    q = q.reshape(B, S, n_heads, d_k).transpose(0, 2, 1, 3)
    k = k.reshape(B, S, n_heads, d_k).transpose(0, 2, 1, 3)
    v = v.reshape(B, S, n_heads, d_k).transpose(0, 2, 1, 3)
    scores = jnp.einsum("bhqd,bhkd->bhqk", q, k) / math.sqrt(float(d_k))
    scores = jnp.where(mask_f[:, None, :, :] > 0, -1e9, scores)
    attn = jax.nn.softmax(scores, axis=-1)
    ctx = jnp.einsum("bhqk,bhkd->bhqd", attn, v)
    ctx = ctx.transpose(0, 2, 1, 3).reshape(B, S, n_heads * d_k)
    proj = ctx @ params["wo"] + params["bo"][0]
    res = proj + x
    mu = jnp.mean(res, axis=-1, keepdims=True)
    var = jnp.mean((res - mu) ** 2, axis=-1, keepdims=True)
    ln = (res - mu) / jnp.sqrt(var + 1e-5) * params["gamma"][0] + params["beta"][0]
    h1 = ln @ params["w1"] + params["b1"][0]
    h1 = 0.5 * h1 * (1.0 + jax.lax.erf(h1 / math.sqrt(2.0)))
    out = h1 @ params["w2"] + params["b2"][0]
    return out, attn


if __name__ == "__main__":
    # Small shapes consistent with the module
    B, S = 2, 8
    n_heads, d_model, d_ff, d_k = 4, 32, 64, 8

    key = jax.random.PRNGKey(0)
    keys = jax.random.split(key, 10)

    def w(k, shape, scale=0.05):
        return (scale * jax.random.normal(k, shape)).astype(jnp.float32)

    params = {
        # stored (in, out) so kernel uses x @ W (equiv. to torch x @ W.T)
        "wq": w(keys[0], (d_model, n_heads * d_k)),
        "bq": jnp.zeros((1, n_heads * d_k), jnp.float32),
        "wk": w(keys[1], (d_model, n_heads * d_k)),
        "bk": jnp.zeros((1, n_heads * d_k), jnp.float32),
        "wv": w(keys[2], (d_model, n_heads * d_k)),
        "bv": jnp.zeros((1, n_heads * d_k), jnp.float32),
        "wo": w(keys[3], (n_heads * d_k, d_model)),
        "bo": jnp.zeros((1, d_model), jnp.float32),
        # fresh nn.LayerNorm default init: weight=1, bias=0
        "gamma": jnp.ones((1, d_model), jnp.float32),
        "beta": jnp.zeros((1, d_model), jnp.float32),
        "w1": w(keys[4], (d_model, d_ff)),
        "b1": w(keys[5], (1, d_ff), 0.01),
        "w2": w(keys[6], (d_ff, d_model)),
        "b2": w(keys[7], (1, d_model), 0.01),
    }

    x = jax.random.normal(keys[8], (B, S, d_model)).astype(jnp.float32)

    # padding-style mask: key positions >= length[b] are masked (1.0)
    lengths = jnp.array([S, S - 2], dtype=jnp.int32)
    key_ids = jnp.arange(S)[None, :]                         # (1, S)
    pad = (key_ids >= lengths[:, None]).astype(jnp.float32)  # (B, S)
    mask_f = jnp.broadcast_to(pad[:, None, :], (B, S, S)).astype(jnp.float32)

    enc_out, attn = encoder_layer(x, mask_f, params, n_heads=n_heads, d_k=d_k)
    enc_out, attn = jax.block_until_ready((enc_out, attn))

    ref_out, ref_attn = _reference(x, mask_f, params, n_heads=n_heads, d_k=d_k)
    assert enc_out.shape == (B, S, d_model)
    assert attn.shape == (B, n_heads, S, S)
    assert jnp.allclose(enc_out, ref_out, atol=1e-4, rtol=1e-4)
    assert jnp.allclose(attn, ref_attn, atol=1e-4, rtol=1e-4)

    print("KERNEL_OK")
</pallas_src>

<mosaic_0001>
module attributes {stable_mosaic.version = 11 : i64} {
  func.func @_encoder_layer_kernel(%arg0: i32, %arg1: memref<8x32xf32, #tpu.memory_space<vmem>>, %arg2: memref<1x8x8xf32, #tpu.memory_space<vmem>>, %arg3: memref<4x32x24xf32, #tpu.memory_space<vmem>>, %arg4: memref<4x1x24xf32, #tpu.memory_space<vmem>>, %arg5: memref<4x8x32xf32, #tpu.memory_space<vmem>>, %arg6: memref<1x32xf32, #tpu.memory_space<vmem>>, %arg7: memref<1x32xf32, #tpu.memory_space<vmem>>, %arg8: memref<1x32xf32, #tpu.memory_space<vmem>>, %arg9: memref<32x64xf32, #tpu.memory_space<vmem>>, %arg10: memref<1x64xf32, #tpu.memory_space<vmem>>, %arg11: memref<64x32xf32, #tpu.memory_space<vmem>>, %arg12: memref<1x32xf32, #tpu.memory_space<vmem>>, %arg13: memref<8x32xf32, #tpu.memory_space<vmem>>, %arg14: memref<1x4x8x8xf32, #tpu.memory_space<vmem>>) attributes {dimension_semantics = [#tpu.dimension_semantics<parallel>], iteration_bounds = array<i64: 2>, scalar_prefetch = 0 : i64, scratch_operands = 0 : i64, tpu.core_type = #tpu.core_type<tc>, window_params = [{transform_indices = @transform_0, window_bounds = array<i64: 8, 32>}, {transform_indices = @transform_1, window_bounds = array<i64: 1, 8, 8>}, {pipeline_mode = #tpu.pipeline_mode<synchronous>, transform_indices = @transform_2, window_bounds = array<i64: 4, 32, 24>}, {pipeline_mode = #tpu.pipeline_mode<synchronous>, transform_indices = @transform_3, window_bounds = array<i64: 4, 1, 24>}, {pipeline_mode = #tpu.pipeline_mode<synchronous>, transform_indices = @transform_4, window_bounds = array<i64: 4, 8, 32>}, {pipeline_mode = #tpu.pipeline_mode<synchronous>, transform_indices = @transform_5, window_bounds = array<i64: 1, 32>}, {pipeline_mode = #tpu.pipeline_mode<synchronous>, transform_indices = @transform_6, window_bounds = array<i64: 1, 32>}, {pipeline_mode = #tpu.pipeline_mode<synchronous>, transform_indices = @transform_7, window_bounds = array<i64: 1, 32>}, {pipeline_mode = #tpu.pipeline_mode<synchronous>, transform_indices = @transform_8, window_bounds = array<i64: 32, 64>}, {pipeline_mode = #tpu.pipeline_mode<synchronous>, transform_indices = @transform_9, window_bounds = array<i64: 1, 64>}, {pipeline_mode = #tpu.pipeline_mode<synchronous>, transform_indices = @transform_10, window_bounds = array<i64: 64, 32>}, {pipeline_mode = #tpu.pipeline_mode<synchronous>, transform_indices = @transform_11, window_bounds = array<i64: 1, 32>}, {transform_indices = @transform_12, window_bounds = array<i64: 8, 32>}, {transform_indices = @transform_13, window_bounds = array<i64: 1, 4, 8, 8>}]} {
    %c0 = arith.constant 0 : index
    %c0_0 = arith.constant 0 : index
    %0 = vector.load %arg1[%c0, %c0_0] : memref<8x32xf32, #tpu.memory_space<vmem>>, vector<8x32xf32>
    %1 = vector.shape_cast %0 : vector<8x32xf32> to vector<1x8x32xf32>
    %2 = vector.shape_cast %1 : vector<1x8x32xf32> to vector<1x8x32xf32>
    %3 = vector.broadcast %2 : vector<1x8x32xf32> to vector<4x8x32xf32>
    %c0_1 = arith.constant 0 : index
    %c0_2 = arith.constant 0 : index
    %c0_3 = arith.constant 0 : index
    %4 = vector.load %arg3[%c0_1, %c0_2, %c0_3] : memref<4x32x24xf32, #tpu.memory_space<vmem>>, vector<4x32x24xf32>
    "tpu.trace_start"() <{level = 10 : i32, message = "hnd,hde->hne"}> : () -> ()
    %cst = arith.constant dense<0.000000e+00> : vector<4x8x24xf32>
    %5 = tpu.matmul %3, %4, %cst {dimension_numbers = #tpu.dot_dimension_numbers<[2], [1], [1], [2], [0, 0, 0, 1, 1, 2], [0], [0]>} : vector<4x8x32xf32>, vector<4x32x24xf32>, vector<4x8x24xf32> -> vector<4x8x24xf32>
    "tpu.trace_stop"() : () -> ()
    %c0_4 = arith.constant 0 : index
    %c0_5 = arith.constant 0 : index
    %c0_6 = arith.constant 0 : index
    %6 = vector.load %arg4[%c0_4, %c0_5, %c0_6] : memref<4x1x24xf32, #tpu.memory_space<vmem>>, vector<4x1x24xf32>
    %7 = vector.broadcast %6 : vector<4x1x24xf32> to vector<4x8x24xf32>
    %8 = arith.addf %5, %7 : vector<4x8x24xf32>
    %9 = vector.extract_strided_slice %8 {offsets = [0, 0, 0], sizes = [4, 8, 8], strides = [1, 1, 1]} : vector<4x8x24xf32> to vector<4x8x8xf32>
    %10 = vector.extract_strided_slice %8 {offsets = [0, 0, 8], sizes = [4, 8, 8], strides = [1, 1, 1]} : vector<4x8x24xf32> to vector<4x8x8xf32>
    %11 = vector.extract_strided_slice %8 {offsets = [0, 0, 16], sizes = [4, 8, 8], strides = [1, 1, 1]} : vector<4x8x24xf32> to vector<4x8x8xf32>
    "tpu.trace_start"() <{level = 10 : i32, message = "gqd,gkd->gqk"}> : () -> ()
    %cst_7 = arith.constant dense<0.000000e+00> : vector<4x8x8xf32>
    %12 = tpu.matmul %9, %10, %cst_7 {dimension_numbers = #tpu.dot_dimension_numbers<[2], [2], [1], [1], [0, 0, 0, 1, 1, 1], [0], [0]>} : vector<4x8x8xf32>, vector<4x8x8xf32>, vector<4x8x8xf32> -> vector<4x8x8xf32>
    "tpu.trace_stop"() : () -> ()
    %13 = vector.shape_cast %12 : vector<4x8x8xf32> to vector<4x1x8x8xf32>
    %c0_8 = arith.constant 0 : index
    %c0_9 = arith.constant 0 : index
    %c0_10 = arith.constant 0 : index
    %14 = vector.load %arg2[%c0_8, %c0_9, %c0_10] : memref<1x8x8xf32, #tpu.memory_space<vmem>>, vector<1x8x8xf32>
    %cst_11 = arith.constant 0.000000e+00 : f32
    %15 = vector.broadcast %cst_11 : f32 to vector<1x8x8xf32>
    %16 = arith.cmpf ogt, %14, %15 : vector<1x8x8xf32>
    %17 = vector.shape_cast %16 : vector<1x8x8xi1> to vector<1x1x8x8xi1>
    %cst_12 = arith.constant -1.000000e+09 : f32
    %18 = vector.shape_cast %17 : vector<1x1x8x8xi1> to vector<1x1x8x8xi1>
    %19 = vector.broadcast %18 : vector<1x1x8x8xi1> to vector<4x1x8x8xi1>
    %20 = vector.broadcast %cst_12 : f32 to vector<4x1x8x8xf32>
    %21 = arith.select %19, %20, %13 : vector<4x1x8x8xi1>, vector<4x1x8x8xf32>
    %cst_13 = arith.constant dense<0xFF800000> : vector<4x1x8xf32>
    %22 = vector.multi_reduction <maximumf>, %21, %cst_13 [3] : vector<4x1x8x8xf32> to vector<4x1x8xf32>
    %23 = vector.shape_cast %22 : vector<4x1x8xf32> to vector<4x1x8x1xf32>
    %24 = vector.broadcast %23 : vector<4x1x8x1xf32> to vector<4x1x8x8xf32>
    %25 = arith.subf %21, %24 : vector<4x1x8x8xf32>
    %26 = math.exp %25 : vector<4x1x8x8xf32>
    %cst_14 = arith.constant dense<0.000000e+00> : vector<4x1x8xf32>
    %27 = vector.multi_reduction <add>, %26, %cst_14 [3] : vector<4x1x8x8xf32> to vector<4x1x8xf32>
    %28 = vector.shape_cast %27 : vector<4x1x8xf32> to vector<4x1x8x1xf32>
    %29 = tpu.reciprocal %28 {approx = true} : vector<4x1x8x1xf32> -> vector<4x1x8x1xf32>
    %30 = arith.mulf %28, %29 : vector<4x1x8x1xf32>
    %cst_15 = arith.constant 2.000000e+00 : f32
    %31 = vector.broadcast %cst_15 : f32 to vector<4x1x8x1xf32>
    %32 = arith.subf %31, %30 : vector<4x1x8x1xf32>
    %33 = arith.mulf %29, %32 : vector<4x1x8x1xf32>
    %34 = vector.broadcast %33 : vector<4x1x8x1xf32> to vector<4x1x8x8xf32>
    %35 = arith.mulf %26, %34 : vector<4x1x8x8xf32>
    %36 = vector.shape_cast %35 : vector<4x1x8x8xf32> to vector<4x8x8xf32>
    %c0_16 = arith.constant 0 : index
    %c0_17 = arith.constant 0 : index
    %c0_18 = arith.constant 0 : index
    %c0_19 = arith.constant 0 : index
    %37 = vector.load %arg14[%c0_16, %c0_17, %c0_18, %c0_19] : memref<1x4x8x8xf32, #tpu.memory_space<vmem>>, vector<1x4x8x8xf32>
    %38 = vector.shape_cast %37 : vector<1x4x8x8xf32> to vector<4x8x8xf32>
    %39 = vector.shape_cast %36 : vector<4x8x8xf32> to vector<1x4x8x8xf32>
    tpu.vector_store %arg14[%c0_16, %c0_17, %c0_18, %c0_19], %39 {strides = array<i32>} : memref<1x4x8x8xf32, #tpu.memory_space<vmem>>, vector<1x4x8x8xf32>,
    %40 = vector.shape_cast %35 : vector<4x1x8x8xf32> to vector<4x8x8xf32>
    "tpu.trace_start"() <{level = 10 : i32, message = "gqk,gkd->gqd"}> : () -> ()
    %cst_20 = arith.constant dense<0.000000e+00> : vector<4x8x8xf32>
    %41 = tpu.matmul %40, %11, %cst_20 {dimension_numbers = #tpu.dot_dimension_numbers<[2], [1], [1], [2], [0, 0, 0, 1, 1, 2], [0], [0]>} : vector<4x8x8xf32>, vector<4x8x8xf32>, vector<4x8x8xf32> -> vector<4x8x8xf32>
    "tpu.trace_stop"() : () -> ()
    %c0_21 = arith.constant 0 : index
    %c0_22 = arith.constant 0 : index
    %42 = vector.load %arg6[%c0_21, %c0_22] : memref<1x32xf32, #tpu.memory_space<vmem>>, vector<1x32xf32>
    %43 = vector.broadcast %42 : vector<1x32xf32> to vector<8x32xf32>
    %44 = arith.addf %0, %43 : vector<8x32xf32>
    %45 = vector.extract_strided_slice %41 {offsets = [0, 0, 0], sizes = [1, 8, 8], strides = [1, 1, 1]} : vector<4x8x8xf32> to vector<1x8x8xf32>
    %46 = vector.shape_cast %45 : vector<1x8x8xf32> to vector<8x8xf32>
    %c0_23 = arith.constant 0 : index
    %c0_24 = arith.constant 0 : index
    %c0_25 = arith.constant 0 : index
    %47 = vector.load %arg5[%c0_23, %c0_24, %c0_25] : memref<4x8x32xf32, #tpu.memory_space<vmem>>, vector<1x8x32xf32>
    %48 = vector.shape_cast %47 : vector<1x8x32xf32> to vector<8x32xf32>
    %cst_26 = arith.constant dense<0.000000e+00> : vector<8x32xf32>
    %49 = tpu.matmul %46, %48, %cst_26 {dimension_numbers = #tpu.dot_dimension_numbers<[1], [0], [0], [1], [0, 0, 1, 1], [], []>} : vector<8x8xf32>, vector<8x32xf32>, vector<8x32xf32> -> vector<8x32xf32>
    %50 = arith.addf %44, %49 : vector<8x32xf32>
    %51 = vector.extract_strided_slice %41 {offsets = [1, 0, 0], sizes = [1, 8, 8], strides = [1, 1, 1]} : vector<4x8x8xf32> to vector<1x8x8xf32>
    %52 = vector.shape_cast %51 : vector<1x8x8xf32> to vector<8x8xf32>
    %c1 = arith.constant 1 : index
    %c0_27 = arith.constant 0 : index
    %c0_28 = arith.constant 0 : index
    %53 = vector.load %arg5[%c1, %c0_27, %c0_28] : memref<4x8x32xf32, #tpu.memory_space<vmem>>, vector<1x8x32xf32>
    %54 = vector.shape_cast %53 : vector<1x8x32xf32> to vector<8x32xf32>
    %cst_29 = arith.constant dense<0.000000e+00> : vector<8x32xf32>
    %55 = tpu.matmul %52, %54, %cst_29 {dimension_numbers = #tpu.dot_dimension_numbers<[1], [0], [0], [1], [0, 0, 1, 1], [], []>} : vector<8x8xf32>, vector<8x32xf32>, vector<8x32xf32> -> vector<8x32xf32>
    %56 = arith.addf %50, %55 : vector<8x32xf32>
    %57 = vector.extract_strided_slice %41 {offsets = [2, 0, 0], sizes = [1, 8, 8], strides = [1, 1, 1]} : vector<4x8x8xf32> to vector<1x8x8xf32>
    %58 = vector.shape_cast %57 : vector<1x8x8xf32> to vector<8x8xf32>
    %c2 = arith.constant 2 : index
    %c0_30 = arith.constant 0 : index
    %c0_31 = arith.constant 0 : index
    %59 = vector.load %arg5[%c2, %c0_30, %c0_31] : memref<4x8x32xf32, #tpu.memory_space<vmem>>, vector<1x8x32xf32>
    %60 = vector.shape_cast %59 : vector<1x8x32xf32> to vector<8x32xf32>
    %cst_32 = arith.constant dense<0.000000e+00> : vector<8x32xf32>
    %61 = tpu.matmul %58, %60, %cst_32 {dimension_numbers = #tpu.dot_dimension_numbers<[1], [0], [0], [1], [0, 0, 1, 1], [], []>} : vector<8x8xf32>, vector<8x32xf32>, vector<8x32xf32> -> vector<8x32xf32>
    %62 = arith.addf %56, %61 : vector<8x32xf32>
    %63 = vector.extract_strided_slice %41 {offsets = [3, 0, 0], sizes = [1, 8, 8], strides = [1, 1, 1]} : vector<4x8x8xf32> to vector<1x8x8xf32>
    %64 = vector.shape_cast %63 : vector<1x8x8xf32> to vector<8x8xf32>
    %c3 = arith.constant 3 : index
    %c0_33 = arith.constant 0 : index
    %c0_34 = arith.constant 0 : index
    %65 = vector.load %arg5[%c3, %c0_33, %c0_34] : memref<4x8x32xf32, #tpu.memory_space<vmem>>, vector<1x8x32xf32>
    %66 = vector.shape_cast %65 : vector<1x8x32xf32> to vector<8x32xf32>
    %cst_35 = arith.constant dense<0.000000e+00> : vector<8x32xf32>
    %67 = tpu.matmul %64, %66, %cst_35 {dimension_numbers = #tpu.dot_dimension_numbers<[1], [0], [0], [1], [0, 0, 1, 1], [], []>} : vector<8x8xf32>, vector<8x32xf32>, vector<8x32xf32> -> vector<8x32xf32>
    %68 = arith.addf %62, %67 : vector<8x32xf32>
    %cst_36 = arith.constant dense<0.000000e+00> : vector<8xf32>
    %69 = vector.multi_reduction <add>, %68, %cst_36 [1] : vector<8x32xf32> to vector<8xf32>
    %70 = vector.shape_cast %69 : vector<8xf32> to vector<8x1xf32>
    %cst_37 = arith.constant 3.200000e+01 : f32
    %71 = vector.broadcast %cst_37 : f32 to vector<8x1xf32>
    %72 = arith.divf %70, %71 : vector<8x1xf32>
    %73 = vector.broadcast %72 : vector<8x1xf32> to vector<8x32xf32>
    %74 = arith.subf %68, %73 : vector<8x32xf32>
    %75 = arith.mulf %74, %74 : vector<8x32xf32>
    %cst_38 = arith.constant dense<0.000000e+00> : vector<8xf32>
    %76 = vector.multi_reduction <add>, %75, %cst_38 [1] : vector<8x32xf32> to vector<8xf32>
    %77 = vector.shape_cast %76 : vector<8xf32> to vector<8x1xf32>
    %cst_39 = arith.constant 3.200000e+01 : f32
    %78 = vector.broadcast %cst_39 : f32 to vector<8x1xf32>
    %79 = arith.divf %77, %78 : vector<8x1xf32>
    %80 = vector.broadcast %72 : vector<8x1xf32> to vector<8x32xf32>
    %81 = arith.subf %68, %80 : vector<8x32xf32>
    %cst_40 = arith.constant 9.99999974E-6 : f32
    %82 = vector.broadcast %cst_40 : f32 to vector<8x1xf32>
    %83 = arith.addf %79, %82 : vector<8x1xf32>
    %84 = math.rsqrt %83 : vector<8x1xf32>
    %85 = vector.broadcast %84 : vector<8x1xf32> to vector<8x32xf32>
    %86 = arith.mulf %81, %85 : vector<8x32xf32>
    %c0_41 = arith.constant 0 : index
    %c0_42 = arith.constant 0 : index
    %87 = vector.load %arg7[%c0_41, %c0_42] : memref<1x32xf32, #tpu.memory_space<vmem>>, vector<1x32xf32>
    %88 = vector.broadcast %87 : vector<1x32xf32> to vector<8x32xf32>
    %89 = arith.mulf %86, %88 : vector<8x32xf32>
    %c0_43 = arith.constant 0 : index
    %c0_44 = arith.constant 0 : index
    %90 = vector.load %arg8[%c0_43, %c0_44] : memref<1x32xf32, #tpu.memory_space<vmem>>, vector<1x32xf32>
    %91 = vector.broadcast %90 : vector<1x32xf32> to vector<8x32xf32>
    %92 = arith.addf %89, %91 : vector<8x32xf32>
    %c0_45 = arith.constant 0 : index
    %c0_46 = arith.constant 0 : index
    %93 = vector.load %arg9[%c0_45, %c0_46] : memref<32x64xf32, #tpu.memory_space<vmem>>, vector<32x64xf32>
    %cst_47 = arith.constant dense<0.000000e+00> : vector<8x64xf32>
    %94 = tpu.matmul %92, %93, %cst_47 {dimension_numbers = #tpu.dot_dimension_numbers<[1], [0], [0], [1], [0, 0, 1, 1], [], []>} : vector<8x32xf32>, vector<32x64xf32>, vector<8x64xf32> -> vector<8x64xf32>
    %c0_48 = arith.constant 0 : index
    %c0_49 = arith.constant 0 : index
    %95 = vector.load %arg10[%c0_48, %c0_49] : memref<1x64xf32, #tpu.memory_space<vmem>>, vector<1x64xf32>
    %96 = vector.broadcast %95 : vector<1x64xf32> to vector<8x64xf32>
    %97 = arith.addf %94, %96 : vector<8x64xf32>
    %cst_50 = arith.constant 5.000000e-01 : f32
    %98 = vector.broadcast %cst_50 : f32 to vector<8x64xf32>
    %99 = arith.mulf %98, %97 : vector<8x64xf32>
    %cst_51 = arith.constant 0.707106769 : f32
    %100 = vector.broadcast %cst_51 : f32 to vector<8x64xf32>
    %101 = arith.mulf %97, %100 : vector<8x64xf32>
    %102 = math.erf %101 : vector<8x64xf32>
    %cst_52 = arith.constant 1.000000e+00 : f32
    %103 = vector.broadcast %cst_52 : f32 to vector<8x64xf32>
    %104 = arith.addf %103, %102 : vector<8x64xf32>
    %105 = arith.mulf %99, %104 : vector<8x64xf32>
    %c0_53 = arith.constant 0 : index
    %c0_54 = arith.constant 0 : index
    %106 = vector.load %arg11[%c0_53, %c0_54] : memref<64x32xf32, #tpu.memory_space<vmem>>, vector<64x32xf32>
    %cst_55 = arith.constant dense<0.000000e+00> : vector<8x32xf32>
    %107 = tpu.matmul %105, %106, %cst_55 {dimension_numbers = #tpu.dot_dimension_numbers<[1], [0], [0], [1], [0, 0, 1, 1], [], []>} : vector<8x64xf32>, vector<64x32xf32>, vector<8x32xf32> -> vector<8x32xf32>
    %c0_56 = arith.constant 0 : index
    %c0_57 = arith.constant 0 : index
    %108 = vector.load %arg12[%c0_56, %c0_57] : memref<1x32xf32, #tpu.memory_space<vmem>>, vector<1x32xf32>
    %109 = vector.broadcast %108 : vector<1x32xf32> to vector<8x32xf32>
    %110 = arith.addf %107, %109 : vector<8x32xf32>
    %c0_58 = arith.constant 0 : index
    %c0_59 = arith.constant 0 : index
    %111 = vector.load %arg13[%c0_58, %c0_59] : memref<8x32xf32, #tpu.memory_space<vmem>>, vector<8x32xf32>
    tpu.vector_store %arg13[%c0_58, %c0_59], %110 {strides = array<i32>} : memref<8x32xf32, #tpu.memory_space<vmem>>, vector<8x32xf32>,
    return
  }
  func.func @transform_0(%arg0: i32) -> (i32, i32) {
    %c0_i32 = arith.constant 0 : i32
    %c0_i32_0 = arith.constant 0 : i32
    return %arg0, %c0_i32 : i32, i32
  }
  func.func @transform_1(%arg0: i32) -> (i32, i32, i32) {
    %c0_i32 = arith.constant 0 : i32
    %c0_i32_0 = arith.constant 0 : i32
    %c0_i32_1 = arith.constant 0 : i32
    return %arg0, %c0_i32, %c0_i32_0 : i32, i32, i32
  }
  func.func @transform_2(%arg0: i32) -> (i32, i32, i32) {
    %c0_i32 = arith.constant 0 : i32
    %c0_i32_0 = arith.constant 0 : i32
    %c0_i32_1 = arith.constant 0 : i32
    %c0_i32_2 = arith.constant 0 : i32
    return %c0_i32, %c0_i32_0, %c0_i32_1 : i32, i32, i32
  }
  func.func @transform_3(%arg0: i32) -> (i32, i32, i32) {
    %c0_i32 = arith.constant 0 : i32
    %c0_i32_0 = arith.constant 0 : i32
    %c0_i32_1 = arith.constant 0 : i32
    %c0_i32_2 = arith.constant 0 : i32
    return %c0_i32, %c0_i32_0, %c0_i32_1 : i32, i32, i32
  }
  func.func @transform_4(%arg0: i32) -> (i32, i32, i32) {
    %c0_i32 = arith.constant 0 : i32
    %c0_i32_0 = arith.constant 0 : i32
    %c0_i32_1 = arith.constant 0 : i32
    %c0_i32_2 = arith.constant 0 : i32
    return %c0_i32, %c0_i32_0, %c0_i32_1 : i32, i32, i32
  }
  func.func @transform_5(%arg0: i32) -> (i32, i32) {
    %c0_i32 = arith.constant 0 : i32
    %c0_i32_0 = arith.constant 0 : i32
    %c0_i32_1 = arith.constant 0 : i32
    return %c0_i32, %c0_i32_0 : i32, i32
  }
  func.func @transform_6(%arg0: i32) -> (i32, i32) {
    %c0_i32 = arith.constant 0 : i32
    %c0_i32_0 = arith.constant 0 : i32
    %c0_i32_1 = arith.constant 0 : i32
    return %c0_i32, %c0_i32_0 : i32, i32
  }
  func.func @transform_7(%arg0: i32) -> (i32, i32) {
    %c0_i32 = arith.constant 0 : i32
    %c0_i32_0 = arith.constant 0 : i32
    %c0_i32_1 = arith.constant 0 : i32
    return %c0_i32, %c0_i32_0 : i32, i32
  }
  func.func @transform_8(%arg0: i32) -> (i32, i32) {
    %c0_i32 = arith.constant 0 : i32
    %c0_i32_0 = arith.constant 0 : i32
    %c0_i32_1 = arith.constant 0 : i32
    return %c0_i32, %c0_i32_0 : i32, i32
  }
  func.func @transform_9(%arg0: i32) -> (i32, i32) {
    %c0_i32 = arith.constant 0 : i32
    %c0_i32_0 = arith.constant 0 : i32
    %c0_i32_1 = arith.constant 0 : i32
    return %c0_i32, %c0_i32_0 : i32, i32
  }
  func.func @transform_10(%arg0: i32) -> (i32, i32) {
    %c0_i32 = arith.constant 0 : i32
    %c0_i32_0 = arith.constant 0 : i32
    %c0_i32_1 = arith.constant 0 : i32
    return %c0_i32, %c0_i32_0 : i32, i32
  }
  func.func @transform_11(%arg0: i32) -> (i32, i32) {
    %c0_i32 = arith.constant 0 : i32
    %c0_i32_0 = arith.constant 0 : i32
    %c0_i32_1 = arith.constant 0 : i32
    return %c0_i32, %c0_i32_0 : i32, i32
  }
  func.func @transform_12(%arg0: i32) -> (i32, i32) {
    %c0_i32 = arith.constant 0 : i32
    %c0_i32_0 = arith.constant 0 : i32
    return %arg0, %c0_i32 : i32, i32
  }
  func.func @transform_13(%arg0: i32) -> (i32, i32, i32, i32) {
    %c0_i32 = arith.constant 0 : i32
    %c0_i32_0 = arith.constant 0 : i32
    %c0_i32_1 = arith.constant 0 : i32
    %c0_i32_2 = arith.constant 0 : i32
    return %arg0, %c0_i32, %c0_i32_0, %c0_i32_1 : i32, i32, i32, i32
  }
}

</mosaic_0001>

<bundles_post_ra>
// kernel: tpu_custom_call.1
= control target key start
LH: loop header
LB: loop body
LE: loop exit
PB: predicated region body
PF: predicated region fallthrough
CT: control target
= control target key end

     0   :  { %s1870_s0 = inlined_call_operand.vmem [shape: f32[16,32], index: 0, kind: input, shape index: {}]   ;;  %s1871_s1 = inlined_call_operand.vmem [shape: f32[2,8,8], index: 1, kind: input, shape index: {}]   ;;  %s1872_s2 = inlined_call_operand.vmem [shape: f32[4,32,24], index: 2, kind: input, shape index: {}]   ;;  %s1873_s3 = inlined_call_operand.vmem [shape: f32[4,1,24], index: 3, kind: input, shape index: {}]   ;;  %s1874_s4 = inlined_call_operand.vmem [shape: f32[4,8,32], index: 4, kind: input, shape index: {}]   ;;  %s1875_s5 = inlined_call_operand.vmem [shape: f32[1,32], index: 5, kind: input, shape index: {}]   ;;  %s1876_s6 = inlined_call_operand.vmem [shape: f32[1,32], index: 6, kind: input, shape index: {}]   ;;  %s1877_s7 = inlined_call_operand.vmem [shape: f32[1,32], index: 7, kind: input, shape index: {}]   ;;  %s1878_s8 = inlined_call_operand.vmem [shape: f32[32,64], index: 8, kind: input, shape index: {}]   ;;  %s1879_s9 = inlined_call_operand.vmem [shape: f32[1,64], index: 9, kind: input, shape index: {}]   ;;  %s1880_s10 = inlined_call_operand.vmem [shape: f32[64,32], index: 10, kind: input, shape index: {}]   ;;  %s1881_s11 = inlined_call_operand.vmem [shape: f32[1,32], index: 11, kind: input, shape index: {}]   ;;  %s1882_s12 = inlined_call_operand.hbm [shape: f32[16,32], index: 12, kind: output, shape index: {0}]   ;;  %s1883_s13 = inlined_call_operand.hbm [shape: f32[2,4,8,8], index: 13, kind: output, shape index: {1}]  }
   0x1   :  { %1889 = sst [smem:[#allocation13_spill]] %s1870_s0 }
   0x2   :  { %1890 = sst [smem:[#allocation14_spill]] %s1871_s1 }
   0x3   :  { %1891 = sst [smem:[#allocation15_spill]] %s1872_s2 }
   0x4   :  { %19 = vsyncpa [#allocation3], 0 }
   0x5   :  { %21 = vsyncpa [#allocation3 + $0x1], 0 }
   0x6   :  { %22 = vsyncpa [#allocation5], 0 }
   0x7   :  { %24 = vsyncpa [#allocation5 + $0x1], 0  ;;  %s1566_s25 = smov 0   ;;  %s1568_s26 = smov 0  }
   0x8   :  { %s1570_s27 = smov 0   ;;  %s1572_s28 = smov 0  }
   0x9 LB: > { %1892 = sst [smem:[#allocation8_spill]] %s1477_s25  ;;  %s1587_s29 = sadd.s32 4294967295, %s1489_s28   ;;  %s1489_s28 = sphi %s1572_s28, %s1904_s28   ;;  %s1485_s27 = sphi %s1570_s27, %s1906_s27   ;;  %s1481_s26 = sphi %s1568_s26, %s1908_s26   ;;  %s1477_s25 = sphi %s1566_s25, %s1907_s25  }
   0xa   : > { %1893 = sst [smem:[#allocation9_spill]] %s1485_s27  ;;  %s1263_s30 = sadd.s32 4294967294, %s1489_s28  }
   0xb   : > { %s1591_s14 = sadd.s32 1, %s1489_s28   ;;  %s299_s15 = sadd.s32 1, %s1485_s27 }
   0xc   : > { %1894 = sst [smem:[#allocation10_spill]] %s1591_s14  ;;  %s296_s16 = ssub.s32 %s1489_s28, %s1591_s14 }
   0xd   : > { %p309_p0 = scmp.ne.s32.totalorder %s1485_s27, %s1481_s26  ;;  %p297_p1 = scmp.eq.s32.totalorder %s296_s16, 0 }
   0xe   : > { %p310_p2 = scmp.eq.s32.totalorder %s1587_s29, 1  ;;  %p315_p3 = scmp.ne.s32.totalorder %s1481_s26, %s1477_s25 }
   0xf   : > { %p316_p4 = scmp.eq.s32.totalorder %s1263_s30, 1  ;;  %p1266_p7 = scmp.ge.s32.totalorder %s1489_s28, 1 }
  0x10   : > { %s1602_s17 = scalar_select %p297_p1, %s1485_s27, %s299_s15  }
  0x11   : > { %p1604_p5 = por %p310_p2, %p309_p0  ;;  %p1608_p6 = por %p316_p4, %p315_p3 }
  0x12   : > { %1895 = sst [smem:[#allocation11_spill]] %s1602_s17  ;;  %p404_p8 = scmp.lt.s32.totalorder %s1489_s28, 3 }
  0x13   : > { %s1897_s19 = scalar_select %p1608_p6, 1, 0 }
  0x14   : > { %p405_p9 = pnand %p1266_p7, %p404_p8 }
  0x15   : > { %1898 = sst [smem:[#allocation12_spill]] %s1897_s19  ;;  %p456_p10 = scmp.lt.s32.totalorder (!%p405_p9), %s1587_s29, 1 }
  0x16   : > { %408 = sbr.rel (%p405_p9) target bundleno = 1552 (0x610), region = 68  ;;  %s1899_s2 = sld [smem:[#allocation15_spill]] (!%p405_p9) }
  0x17   : > { %s1900_s0 = sld [smem:[#allocation13_spill]] (!%p405_p9)  ;;  %s1491_s15 = smov (!%p405_p9), 120  }
  0x18   : > { %s1901_s1 = sld [smem:[#allocation14_spill]] (!%p405_p9) }
  0x1b   : > { %s1634_s22 = scalar_select %p456_p10, %s1587_s29, 1  ;;  %vm497_vm0 = vcmask 261120   ;;  %v1364_v17 = vld [vmem:[%s1873_s3] ss:$0 sm:$0xff]  ;;  %v1365_v20 = vld [vmem:[%s1873_s3 + $0x1] ss:$0 sm:$0xff] }
  0x1c   : > { %v468_v0 = vld [vmem:[%s1899_s2 + $0x18] sm:$0xff]  ;;  %v467_v2 = vld [vmem:[%s1899_s2 + $0x10] sm:$0xff]  ;;  %v466_v4 = vld [vmem:[%s1899_s2 + $0x8] sm:$0xff]  ;;  %vm584_vm1 = vcmask 64512   ;;  %vm1096_vm11 = vcmask 523264  }
  0x1d   : > { %v472_v1 = vld [vmem:[%s1899_s2 + $0x38] sm:$0xff]  ;;  %513 = vmatpush.msra.mxu0 %v468_v0  ;;  %v471_v3 = vld [vmem:[%s1899_s2 + $0x30] sm:$0xff]  ;;  %v470_v5 = vld [vmem:[%s1899_s2 + $0x28] sm:$0xff]  ;;  %s1269_s21 = sshll.u32 %s1634_s22, 3  ;;  %s1492_s22 = smov 112  }
  0x1e   : > { %533 = vmatpush.msra.mxu2 %v472_v1  ;;  %v480_v6 = vld [vmem:[%s1899_s2 + $0x78] sm:$0xff]  ;;  %v479_v7 = vld [vmem:[%s1899_s2 + $0x70] sm:$0xff]  ;;  %v465_v8 = vld [vmem:[%s1899_s2] sm:$0xff]  ;;  %s459_s24 = scalar_lea.vmem %s1900_s0, %s1269_s21  ;;  %s463_s25 = scalar_lea.vmem %s1901_s1, %s1269_s21 }
  0x1f   : > { %514 = vmatpush.msra.mxu0 %v467_v2  ;;  %v469_v9 = vld [vmem:[%s1899_s2 + $0x20] sm:$0xff]  ;;  %573 = vmatpush.msra.mxu3 %v480_v6  ;;  %v476_v10 = vld [vmem:[%s1899_s2 + $0x58] sm:$0xff]  ;;  %v478_v11 = vld [vmem:[%s1899_s2 + $0x68] sm:$0xff]  ;;  %s1732_s21 = sand.u32 1, %s1481_s26  }
  0x20   : > { %534 = vmatpush.msra.mxu2 %v471_v3  ;;  %v1660_v12 = vld [vmem:[%s459_s24] sm:$0xff]  ;;  %v475_v13 = vld [vmem:[%s1899_s2 + $0x50] sm:$0xff]  ;;  %v474_v15 = vld [vmem:[%s1899_s2 + $0x48] sm:$0xff]  ;;  %s1268_s19 = sshll.u32 %s1732_s21, 5  ;;  %s1127_s27 = scalar_lea.sflag [#allocation5], %s1732_s21 }
  0x21   : > { %515 = vmatpush.msra.mxu0 %v466_v4  ;;  %574 = vmatpush.msra.mxu3 %v479_v7  ;;  %v477_v14 = vld [vmem:[%s1899_s2 + $0x60] sm:$0xff] }
  0x22   : > { %535 = vmatpush.msra.mxu2 %v470_v5  ;;  %v473_v16 = vld [vmem:[%s1899_s2 + $0x40] sm:$0xff] }
  0x23   : > { %516 = vmatpush.msra.mxu0 %v465_v8  ;;  %575 = vmatpush.msra.mxu3 %v478_v11  ;;  %v1366_v23 = vld [vmem:[%s1873_s3 + $0x2] ss:$0 sm:$0xff]  ;;  %v1367_v26 = vld [vmem:[%s1873_s3 + $0x3] ss:$0 sm:$0xff] }
  0x24   : > { %536 = vmatpush.msra.mxu2 %v469_v9  ;;  %1271 = vmatmul.msk.f32.vlgmr.msra.gmra.mxu0 %vm497_vm0, %v1660_v12  ;;  %v690_v33 = vld [vmem:[%s463_s25] sm:$0xff]  ;;  %s1304_s25 = sshll.u32 %s1587_s29, 5 }
  0x25   : > { %1272 = vmatmul.msk.f32.vlgmr.msra.gmra.mxu2 %vm497_vm0, %v1660_v12  ;;  %576 = vmatpush.msra.mxu3 %v477_v14  ;;  %vm691_vm2 = vcmp.gt.f32.partialorder %v690_v33, 0.0  ;;  %s1152_s17 = scalar_lea.hbm %s1883_s13, %s1304_s25 }
  0x26   : > { %553 = vmatpush.msrb.mxu2 %v476_v10  ;;  %1274 = vmatmul.msk.f32.vlgmr.msra.gmra.mxu3 %vm497_vm0, %v1660_v12  ;;  %s1155_s16 = sshll.u32 %s1152_s17, 4  ;;  %s1156_s16 = int_to_ptr.hbm [resolvable:$true] %s1155_s16 }
  0x27   : > { %s1409_s20 = sshra.s32 %s1156_s16, 4  ;;  %s1410_s20 = int_to_ptr.hbm [resolvable:$true] %s1409_s20 }
  0x28   : > { %554 = vmatpush.msrb.mxu2 %v475_v13  ;;  %s1411_s14 = scalar_lea.hbm %s1410_s20, 32  ;;  %p1416_p0 = scmp.lt.s32.totalorder %s1410_s20, %s1883_s13 }
  0x29   : > { %p1412_p11 = scmp.ne.s32.totalorder %s1410_s20, %s1411_s14 }
  0x2a   : > { %555 = vmatpush.msrb.mxu2 %v474_v15 }
  0x2b   : > { %p1413_p12 = pnand %p1412_p11, %p1604_p5 }
  0x2c   : > { %556 = vmatpush.msrb.mxu2 %v473_v16 }
  0x2d   : > { %1273 = vmatmul.msk.f32.vlgmr.msrb.gmra.mxu2 %vm497_vm0, %v1660_v12  ;;  %p1414_p13 = pneg %p1413_p12 }
  0xa1   : > { %v518_v18 = vpop.f32.mrf.mxu0 }
  0xa2   : > { %v519_v19 = vadd.f32 %v1364_v17, %v518_v18 }
  0xa4   : > { %582 = vrot.lane.b32.xlu1 %v519_v19, %s1491_s15 }
  0xa8   : > { %v538_v21 = vpop.f32.mrf.mxu2 }
  0xa9   : > { %v539_v22 = vadd.f32 %v1365_v20, %v538_v21  ;;  %v578_v27 = vpop.f32.mrf.mxu3 }
  0xaa   : > { %v1697_v28 = vadd.f32 %v1367_v26, %v578_v27 }
  0xab   : > { %v1359_v40 = vpack.i.bf16 %v539_v22, %v519_v19 }
  0xac   : > { %610 = vrot.lane.b32.xlu1 %v539_v22, %s1491_s15 }
  0xb0   : > { %v558_v24 = vpop.f32.mrf.mxu2 }
  0xb1   : > { %v1691_v25 = vadd.f32 %v1366_v23, %v558_v24 }
  0xb3   : > { %637 = vrot.lane.b32.xlu0 %v1691_v25, %s1491_s15  ;;  %v1354_v6 = vpack.i.bf16 %v1697_v28, %v1691_v25 }
  0xbb   : > { %664 = vrot.lane.b32.xlu0 %v1697_v28, %s1491_s15  ;;  %s1736_s15 = scalar_lea.vmem [#allocation4], %s1268_s19 }
  0xbc   : > { %s1153_s30 = sshll.u32 %s1736_s15, 4  ;;  %s1154_s30 = int_to_ptr.vmem [resolvable:$true] %s1153_s30 }
 0x116   : > { %v583_v29 = vpop.permute.xlu1 %582 }
 0x117   : > { %1275 = vmatpush.xpose.msk.msrb.mxu0 %vm584_vm1, %v583_v29 }
 0x11a   : > { %1276 = vmatmul.msk.f32.vlgmr.msrb.gmra.mxu0 %vm584_vm1, %v519_v19 }
 0x11e   : > { %v611_v30 = vpop.permute.xlu1 %610 }
 0x11f   : > { %1277 = vmatpush.xpose.msk.msra.mxu1 %vm584_vm1, %v611_v30 }
 0x122   : > { %1278 = vmatmul.msk.f32.vlgmr.msra.gmra.mxu1 %vm584_vm1, %v539_v22 }
 0x125   : > { %v638_v31 = vpop.permute.xlu0 %637 }
 0x126   : > { %1279 = vmatpush.xpose.msk.msra.mxu2 %vm584_vm1, %v638_v31 }
 0x129   : > { %1280 = vmatmul.msk.f32.vlgmr.msra.gmra.mxu2 %vm584_vm1, %v1691_v25 }
 0x12d   : > { %v665_v32 = vpop.permute.xlu0 %664 }
 0x12e   : > { %1281 = vmatpush.xpose.msk.msrb.mxu3 %vm584_vm1, %v665_v32 }
 0x131   : > { %1282 = vmatmul.msk.f32.vlgmr.msrb.gmra.mxu3 %vm584_vm1, %v1697_v28 }
 0x197   : > { %v606_v34 = vpop.f32.mrf.mxu0 }
 0x198   : > { %v694_v35 = vsel %vm691_vm2, -1e+09, %v606_v34 }
 0x199   : > { %v698_v36 = vsel %vm584_vm1, %v694_v35, -inf }
 0x19a   : > { %699 = vmax.xlane.f32.xlu0 %v698_v36  ;;  %v1288_v36 = vld [vmem:[%s1874_s4 + $0x8] sm:$0xff] }
 0x19f   : > { %v633_v37 = vpop.f32.mrf.mxu1 }
 0x1a0   : > { %v695_v38 = vsel %vm691_vm2, -1e+09, %v633_v37 }
 0x1a1   : > { %v701_v39 = vsel %vm584_vm1, %v695_v38, -inf }
 0x1a2   : > { %702 = vmax.xlane.f32.xlu1 %v701_v39  ;;  %v1290_v39 = vld [vmem:[%s1874_s4 + $0x10] sm:$0xff] }
 0x1ac   : > { %v660_v44 = vpop.f32.mrf.mxu2 }
 0x1ad   : > { %v696_v45 = vsel %vm691_vm2, -1e+09, %v660_v44 }
 0x1ae   : > { %1360 = vrot.lane.b32.xlu0 %v1359_v40, %s1492_s22  ;;  %v704_v46 = vsel %vm584_vm1, %v696_v45, -inf }
 0x1b4   : > { %v687_v41 = vpop.f32.mrf.mxu3 }
 0x1b5   : > { %v697_v42 = vsel %vm691_vm2, -1e+09, %v687_v41 }
 0x1b6   : > { %v707_v43 = vsel %vm584_vm1, %v697_v42, -inf }
 0x1b7   : > { %708 = vmax.xlane.f32.xlu2 %v707_v43  ;;  %v1368_v43 = vld [vmem:[%s1875_s5] ss:$0 sm:$0xff] }
 0x1b8   : > { %v866_v44 = vadd.f32 %v1368_v43, %v1660_v12  ;;  %v1085_v43 = vld [vmem:[%s1880_s10 + $0x8] sm:$0xff] }
 0x1bf   : > { %705 = vmax.xlane.f32.xlu2 %v704_v46 }
 0x20d   : > { %v700_v47 = vpop.xlane.xlu0 %699 }
 0x20e   : > { %v710_v48 = vsub.f32 %v694_v35, %v700_v47  ;;  %v867_v35 = vld [vmem:[%s1874_s4] sm:$0xff] }
 0x210   : > { %v714_v49 = vmul.f32 1.442695, %v710_v48 }
 0x212   : > { %1373 = vpow2.f32 %v714_v49 }
 0x215   : > { %v703_v50 = vpop.xlane.xlu1 %702 }
 0x216   : > { %v711_v51 = vsub.f32 %v695_v38, %v703_v50  ;;  %v1292_v38 = vld [vmem:[%s1874_s4 + $0x18] sm:$0xff] }
 0x218   : > { %v1374_v52 = vpop.eup %1373  ;;  %v716_v53 = vmul.f32 1.442695, %v711_v51 }
 0x219   : > { %v722_v54 = vsel %vm584_vm1, %v1374_v52, 0.0 }
 0x21a   : > { %1375 = vpow2.f32 %v716_v53  ;;  %723 = vadd.xlane.f32.xlu2 %v722_v54  ;;  %v1493_v54 = vmov 32.0  }
 0x220   : > { %v1376_v55 = vpop.eup %1375  ;;  %v1361_v56 = vpop.permute.xlu0 %1360 }
 0x221   : > { %v1363_v57 = vunpack.i.h.bf16 %v1361_v56  ;;  %v1362_v58 = vunpack.i.l.bf16 %v1361_v56  ;;  %v725_v59 = vsel %vm584_vm1, %v1376_v55, 0.0 }
 0x222   : > { %726 = vadd.xlane.f32.xlu2 %v725_v59 }
 0x223   : > { %779 = vmatpush.msra.mxu0 %v1362_v58  ;;  %805 = vmatpush.msrb.mxu1 %v1363_v57 }
 0x225   : > { %886 = vmatpush.msrb.mxu0 %v867_v35  ;;  %912 = vmatpush.msra.mxu1 %v1288_v36  ;;  %v1088_v36 = vld [vmem:[%s1880_s10 + $0x20] sm:$0xff] }
 0x22a   : > { %v709_v60 = vpop.xlane.xlu2 %708 }
 0x22b   : > { %v713_v61 = vsub.f32 %v697_v42, %v709_v60 }
 0x22d   : > { %v720_v62 = vmul.f32 1.442695, %v713_v61 }
 0x22f   : > { %1377 = vpow2.f32 %v720_v62 }
 0x232   : > { %v706_v63 = vpop.xlane.xlu2 %705 }
 0x233   : > { %v712_v0 = vsub.f32 %v696_v45, %v706_v63 }
 0x235   : > { %v1378_v1 = vpop.eup %1377  ;;  %v718_v2 = vmul.f32 1.442695, %v712_v0 }
 0x236   : > { %v731_v3 = vsel %vm584_vm1, %v1378_v1, 0.0 }
 0x237   : > { %1379 = vpow2.f32 %v718_v2  ;;  %732 = vadd.xlane.f32.xlu2 %v731_v3  ;;  %v1011_v2 = vld [vmem:[%s1878_s8 + $0x10] sm:$0xff]  ;;  %v1010_v3 = vld [vmem:[%s1878_s8 + $0x8] sm:$0xff] }
 0x23d   : > { %v1380_v4 = vpop.eup %1379 }
 0x23e   : > { %v728_v5 = vsel %vm584_vm1, %v1380_v4, 0.0 }
 0x23f   : > { %729 = vadd.xlane.f32.xlu2 %v728_v5 }
 0x257   : > { %1355 = vrot.lane.b32.xlu2 %v1354_v6, %s1492_s22 }
 0x28d   : > { %v724_v7 = vpop.xlane.xlu2 %723 }
 0x28e   : > { %1381 = vrcp.f32 %v724_v7 }
 0x294   : > { %v1382_v8 = vpop.eup %1381 }
 0x295   : > { %v738_v9 = vmul.f32 %v1382_v8, %v724_v7  ;;  %v727_v10 = vpop.xlane.xlu2 %726 }
 0x296   : > { %1383 = vrcp.f32 %v727_v10 }
 0x297   : > { %v742_v11 = vsub.f32 2.0, %v738_v9 }
 0x299   : > { %v746_v13 = vmul.f32 %v1382_v8, %v742_v11 }
 0x29b   : > { %v750_v14 = vmul.f32 %v1374_v52, %v746_v13 }
 0x29c   : > { %v1384_v15 = vpop.eup %1383 }
 0x29d   : > { %v739_v16 = vmul.f32 %v1384_v15, %v727_v10  ;;  %1283 = vmatmul.msk.f32.vlgmr.msra.gmra.mxu0 %vm584_vm1, %v750_v14  ;;  %754 = vst.msk [vmem:[%s1736_s15] sm:$0xff] %vm584_vm1, %v750_v14 }
 0x29f   : > { %v743_v17 = vsub.f32 2.0, %v739_v16 }
 0x2a1   : > { %v747_v18 = vmul.f32 %v1384_v15, %v743_v17  ;;  %v1369_v15 = vld [vmem:[%s1876_s6] ss:$0 sm:$0xff] }
 0x2a3   : > { %v751_v19 = vmul.f32 %v1376_v55, %v747_v18  ;;  %v1370_v18 = vld [vmem:[%s1877_s7] ss:$0 sm:$0xff] }
 0x2a5   : > { %1284 = vmatmul.msk.f32.vlgmr.msrb.gmra.mxu1 %vm584_vm1, %v751_v19  ;;  %755 = vst.msk [vmem:[%s1736_s15 + $0x8] sm:$0xff] %vm584_vm1, %v751_v19 }
 0x2aa   : > { %v733_v20 = vpop.xlane.xlu2 %732 }
 0x2ab   : > { %1385 = vrcp.f32 %v733_v20 }
 0x2b1   : > { %v1386_v21 = vpop.eup %1385 }
 0x2b2   : > { %v741_v22 = vmul.f32 %v1386_v21, %v733_v20  ;;  %v730_v23 = vpop.xlane.xlu2 %729 }
 0x2b3   : > { %1387 = vrcp.f32 %v730_v23 }
 0x2b4   : > { %v745_v24 = vsub.f32 2.0, %v741_v22  ;;  %1389 = vrcp.f32 %v1493_v54 }
 0x2b6   : > { %v749_v25 = vmul.f32 %v1386_v21, %v745_v24  ;;  %v1371_v21 = vld [vmem:[%s1879_s9] ss:$0 sm:$0xff] }
 0x2b8   : > { %v753_v26 = vmul.f32 %v1378_v1, %v749_v25  ;;  %v1012_v1 = vld [vmem:[%s1878_s8 + $0x18] sm:$0xff] }
 0x2b9   : > { %v1388_v27 = vpop.eup %1387  ;;  %1032 = vmatpush.msra.mxu0 %v1012_v1 }
 0x2ba   : > { %v740_v28 = vmul.f32 %v1388_v27, %v730_v23  ;;  %v1356_v29 = vpop.permute.xlu2 %1355  ;;  %757 = vst.msk [vmem:[%s1736_s15 + $0x18] sm:$0xff] %vm584_vm1, %v753_v26  ;;  %v1390_v55 = vpop.eup %1389 }
 0x2bb   : > { %v1358_v30 = vunpack.i.h.bf16 %v1356_v29  ;;  %v1357_v31 = vunpack.i.l.bf16 %v1356_v29  ;;  %v974_v56 = vmul.f32 32.0, %v1390_v55  ;;  %vm978_vm3 = vweird.f32 %v1390_v55  ;;  %1033 = vmatpush.msra.mxu0 %v1011_v2 }
 0x2bc   : > { %v744_v32 = vsub.f32 2.0, %v740_v28 }
 0x2bd   : > { %831 = vmatpush.msrb.mxu2 %v1357_v31  ;;  %857 = vmatpush.msra.mxu3 %v1358_v30  ;;  %v975_v57 = vsub.f32 1.0, %v974_v56  ;;  %v1090_v30 = vld [vmem:[%s1880_s10 + $0x30] sm:$0xff] }
 0x2be   : > { %v748_v33 = vmul.f32 %v1388_v27, %v744_v32  ;;  %1286 = vmatmul.msk.f32.vlgmr.msra.gmra.mxu3 %vm584_vm1, %v753_v26  ;;  %1034 = vmatpush.msra.mxu0 %v1010_v3  ;;  %v1091_v27 = vld [vmem:[%s1880_s10 + $0x38] sm:$0xff] }
 0x2bf   : > { %964 = vmatpush.msrb.mxu3 %v1292_v38  ;;  %938 = vmatpush.msra.mxu2 %v1290_v39  ;;  %v976_v58 = vmul.f32 %v1390_v55, %v975_v57  ;;  %v1087_v38 = vld [vmem:[%s1880_s10 + $0x18] sm:$0xff] }
 0x2c0   : > { %v752_v34 = vmul.f32 %v1380_v4, %v748_v33  ;;  %v1009_v4 = vld [vmem:[%s1878_s8] sm:$0xff]  ;;  %1108 = vmatpush.msrb.mxu1 %v1091_v27  ;;  %v1089_v33 = vld [vmem:[%s1880_s10 + $0x28] sm:$0xff] }
 0x2c1   : > { %v977_v59 = vadd.f32 %v1390_v55, %v976_v58  ;;  %1035 = vmatpush.msra.mxu0 %v1009_v4 }
 0x2c2   : > { %1285 = vmatmul.msk.f32.vlgmr.msrb.gmra.mxu2 %vm584_vm1, %v752_v34  ;;  %756 = vst.msk [vmem:[%s1736_s15 + $0x10] sm:$0xff] %vm584_vm1, %v752_v34  ;;  %1109 = vmatpush.msrb.mxu1 %v1090_v30  ;;  %s1415_s15 = scalar_lea.hbm %s1883_s13, 64 }
 0x2c3   : > { %v979_v12 = vsel %vm978_vm3, %v1390_v55, %v977_v59  ;;  %p1417_p1 = scmp.lt.s32.totalorder %s1415_s15, %s1411_s14 }
 0x2c4   : > { %1110 = vmatpush.msrb.mxu1 %v1089_v33 }
 0x2c5   : > { %p1418_p2 = por %p1417_p1, %p1416_p0 }
 0x2c6   : > { %1111 = vmatpush.msrb.mxu1 %v1088_v36 }
 0x2c7   : > { %p1419_p3 = pnand %p1418_p2, %p1414_p13 }
 0x2c8   : > { %1112 = vmatpush.msrb.mxu1 %v1087_v38 }
 0x31a   : > { %v781_v37 = vpop.f32.mrf.mxu0 }
 0x31b   : > { %1287 = vmatmul.msk.f32.vlgmr.msrb.gmra.mxu0 %vm584_vm1, %v781_v37 }
 0x322   : > { %v807_v40 = vpop.f32.mrf.mxu1 }
 0x323   : > { %1289 = vmatmul.msk.f32.vlgmr.msra.gmra.mxu1 %vm584_vm1, %v807_v40 }
 0x341   : > { %v859_v41 = vpop.f32.mrf.mxu3 }
 0x342   : > { %1293 = vmatmul.msk.f32.vlgmr.msrb.gmra.mxu3 %vm584_vm1, %v859_v41  ;;  %v1086_v41 = vld [vmem:[%s1880_s10 + $0x10] sm:$0xff] }
 0x343   : > { %1113 = vmatpush.msrb.mxu1 %v1086_v41 }
 0x345   : > { %v833_v42 = vpop.f32.mrf.mxu2  ;;  %1114 = vmatpush.msrb.mxu1 %v1085_v43 }
 0x346   : > { %1291 = vmatmul.msk.f32.vlgmr.msra.gmra.mxu2 %vm584_vm1, %v833_v42 }
 0x398   : > { %v888_v45 = vpop.f32.mrf.mxu0 }
 0x399   : > { %v891_v47 = vadd.f32 %v888_v45, %v866_v44  ;;  %v1084_v45 = vld [vmem:[%s1880_s10] sm:$0xff] }
 0x39a   : > { %1115 = vmatpush.msrb.mxu1 %v1084_v45 }
 0x3a0   : > { %v914_v46 = vpop.f32.mrf.mxu1 }
 0x3a1   : > { %v917_v48 = vadd.f32 %v914_v46, %v891_v47 }
 0x3c5   : > { %v966_v51 = vpop.f32.mrf.mxu3 }
 0x3c9   : > { %v940_v49 = vpop.f32.mrf.mxu2 }
 0x3ca   : > { %v943_v50 = vadd.f32 %v940_v49, %v917_v48 }
 0x3cc   : > { %v969_v52 = vadd.f32 %v966_v51, %v943_v50 }
 0x3ce   : > { %v970_v53 = vsel %vm497_vm0, %v969_v52, 0.0 }
 0x3cf   : > { %971 = vadd.xlane.f32.xlu1 %v970_v53 }
 0x442   : > { %v972_v60 = vpop.xlane.xlu1 %971 }
 0x443   : > { %v980_v61 = vmul.f32 %v979_v12, %v972_v60 }
 0x445   : > { %v981_v62 = vsub.f32 %v969_v52, %v980_v61 }
 0x447   : > { %v982_v63 = vmul.f32 %v981_v62, %v981_v62 }
 0x449   : > { %v983_v0 = vsel %vm497_vm0, %v982_v63, 0.0 }
 0x44a   : > { %984 = vadd.xlane.f32.xlu1 %v983_v0 }
 0x4bd   : > { %v985_v5 = vpop.xlane.xlu1 %984 }
 0x4be   : > { %v986_v6 = vmul.f32 %v985_v5, %v979_v12 }
 0x4c0   : > { %v987_v7 = vadd.f32 1e-05, %v986_v6 }
 0x4c2   : > { %1391 = vrsqrt.f32 %v987_v7  ;;  %vm994_vm5 = vweird.f32 %v987_v7 }
 0x4c8   : > { %v1392_v8 = vpop.eup %1391 }
 0x4c9   : > { %v989_v9 = vmul.f32 %v1392_v8, %v987_v7  ;;  %vm995_vm4 = vweird.f32 %v1392_v8 }
 0x4ca   : > { %vm996_vm6 = vmor %vm994_vm5, %vm995_vm4 }
 0x4cb   : > { %v990_v10 = vmul.f32 %v1392_v8, %v989_v9 }
 0x4cd   : > { %v991_v11 = vmul.f32 0.5, %v990_v10 }
 0x4cf   : > { %v992_v13 = vsub.f32 1.5, %v991_v11 }
 0x4d1   : > { %v993_v14 = vmul.f32 %v1392_v8, %v992_v13 }
 0x4d3   : > { %v997_v16 = vsel %vm996_vm6, %v1392_v8, %v993_v14 }
 0x4d4   : > { %v998_v17 = vmul.f32 %v997_v16, %v981_v62 }
 0x4d6   : > { %v1003_v19 = vmul.f32 %v1369_v15, %v998_v17 }
 0x4d8   : > { %v1008_v20 = vadd.f32 %v1370_v18, %v1003_v19 }
 0x4da   : > { %1294 = vmatmul.msk.f32.vlgmr.msra.gmra.mxu0 %vm497_vm0, %v1008_v20 }
 0x557   : > { %v1037_v22 = vpop.f32.mrf.mxu0 }
 0x558   : > { %v1038_v23 = vadd.f32 %v1371_v21, %v1037_v22 }
 0x55a   : > { %v1041_v24 = vmul.f32 0.70710677, %v1038_v23  ;;  %v1040_v3 = vmul.f32 0.5, %v1038_v23 }
 0x55c   : > { %v1042_v25 = vmul.f32 %v1041_v24, %v1041_v24 }
 0x55e   : > { %v1043_v26 = vmin.f32 %v1042_v25, 16.0 }
 0x560   : > { %v1044_v28 = vmul.f32 2.1237322e-06, %v1043_v26  ;;  %v1055_v29 = vmul.f32 3.8918573e-05, %v1043_v26 }
 0x562   : > { %v1045_v31 = vadd.f32 0.00028619796, %v1044_v28  ;;  %v1056_v32 = vadd.f32 0.001143296, %v1055_v29 }
 0x564   : > { %v1046_v34 = vmul.f32 %v1045_v31, %v1043_v26  ;;  %v1057_v35 = vmul.f32 %v1056_v32, %v1043_v26 }
 0x566   : > { %v1058_v37 = vadd.f32 0.014752088, %v1057_v35  ;;  %v1047_v39 = vadd.f32 0.0036580483, %v1046_v34 }
 0x568   : > { %v1059_v40 = vmul.f32 %v1058_v37, %v1043_v26  ;;  %v1048_v44 = vmul.f32 %v1047_v39, %v1043_v26 }
 0x56a   : > { %v1060_v42 = vadd.f32 0.112945676, %v1059_v40  ;;  %v1049_v48 = vadd.f32 0.05243302, %v1048_v44 }
 0x56c   : > { %v1061_v46 = vmul.f32 %v1060_v42, %v1043_v26  ;;  %v1050_v51 = vmul.f32 %v1049_v48, %v1043_v26 }
 0x56e   : > { %v1062_v47 = vadd.f32 0.4994258, %v1061_v46  ;;  %v1051_v52 = vadd.f32 0.18741608, %v1050_v51 }
 0x570   : > { %v1063_v49 = vmul.f32 %v1062_v47, %v1043_v26  ;;  %v1052_v54 = vmul.f32 %v1051_v52, %v1043_v26 }
 0x572   : > { %v1064_v50 = vadd.f32 1.0, %v1063_v49  ;;  %v1053_v58 = vadd.f32 1.1283791, %v1052_v54 }
 0x574   : > { %1393 = vrcp.f32 %v1064_v50  ;;  %v1076_v57 = vand.u32 2147483648, %v1064_v50  ;;  %v1074_v12 = vand.u32 2147483647, %v1064_v50  ;;  %vm1070_vm8 = vweird.f32 %v1064_v50 }
 0x575   : > { %v1054_v62 = vmul.f32 %v1053_v58, %v1041_v24 }
 0x576   : > { %v1077_v61 = vor.u32 1.1754944e-38, %v1076_v57  ;;  %vm1075_vm10 = vcmp.eq.f32.partialorder %v1074_v12, 8.507059e+37 }
 0x57a   : > { %v1394_v53 = vpop.eup %1393 }
 0x57b   : > { %v1066_v55 = vmul.f32 %v1394_v53, %v1064_v50  ;;  %vm1071_vm7 = vweird.f32 %v1394_v53 }
 0x57c   : > { %vm1072_vm9 = vmor %vm1070_vm8, %vm1071_vm7 }
 0x57d   : > { %v1067_v56 = vsub.f32 1.0, %v1066_v55 }
 0x57f   : > { %v1068_v59 = vmul.f32 %v1394_v53, %v1067_v56 }
 0x581   : > { %v1069_v60 = vadd.f32 %v1394_v53, %v1068_v59 }
 0x583   : > { %v1073_v63 = vsel %vm1072_vm9, %v1394_v53, %v1069_v60 }
 0x584   : > { %v1078_v0 = vsel %vm1075_vm10, %v1077_v61, %v1073_v63 }
 0x585   : > { %v1079_v1 = vmul.f32 %v1078_v0, %v1054_v62 }
 0x587   : > { %v1295_v2 = vclamps-f32 %v1079_v1, 1.0 }
 0x589   : > { %v1082_v4 = vadd.f32 1.0, %v1295_v2 }
 0x58b   : > { %v1083_v5 = vmul.f32 %v1082_v4, %v1040_v3 }
 0x58d   : > { %1296 = vmatmul.msk.f32.vlgmr.msrb.gmra.mxu1 %vm1096_vm11, %v1083_v5 }
 0x58e   : > { %1422 = shalt.err (!%p1419_p3)
}
 0x58f   : > { %s1494_s25 = smov 128   ;;  %s1495_s22 = smov 8   ;;  %v1372_v6 = vld [vmem:[%s1881_s11] ss:$0 sm:$0xff] }
 0x590   : > { %1306 = dma.vmem_to_hbm [thread:$0]  (%p1604_p5), %s1154_s30, 512, %s1156_s16, %s1127_s27, %s1494_s25, %s1494_s25, %s1495_s22  }
 0x591   : > { %s1267_s19 = sshll.u32 %s1732_s21, 3  ;;  %s1299_s17 = sshll.u32 %s1587_s29, 3 }
 0x592   : > { %s1137_s0 = scalar_lea.hbm %s1882_s12, %s1299_s17  ;;  %s448_s14 = scalar_lea.vmem [#allocation2], %s1267_s19 }
 0x593   : > { %s1139_s15 = sshll.u32 %s448_s14, 4  ;;  %s1141_s2 = sshll.u32 %s1137_s0, 4  ;;  %s1140_s15 = int_to_ptr.vmem [resolvable:$true] %s1139_s15  ;;  %s1142_s2 = int_to_ptr.hbm [resolvable:$true] %s1141_s2 }
 0x594   : > { %s1122_s30 = scalar_lea.sflag [#allocation3], %s1732_s21  ;;  %s1437_s29 = sshra.s32 %s1142_s2, 4  ;;  %s1438_s29 = int_to_ptr.hbm [resolvable:$true] %s1437_s29 }
 0x595   : > { %s1439_s16 = scalar_lea.hbm %s1438_s29, 8  ;;  %s1443_s22 = scalar_lea.hbm %s1882_s12, 16 }
 0x596   : > { %p1440_p4 = scmp.ne.s32.totalorder %s1438_s29, %s1439_s16  ;;  %p1444_p9 = scmp.lt.s32.totalorder %s1438_s29, %s1882_s12 }
 0x597   : > { %p1445_p10 = scmp.lt.s32.totalorder %s1443_s22, %s1439_s16 }
 0x598   : > { %p1441_p7 = pnand %p1440_p4, %p1604_p5 }
 0x599   : > { %p1446_p11 = por %p1445_p10, %p1444_p9 }
 0x59a   : > { %p1442_p8 = pneg %p1441_p7 }
 0x59c   : > { %p1447_p12 = pnand %p1446_p11, %p1442_p8 }
 0x60a   : > { %v1117_v7 = vpop.f32.mrf.mxu1 }
 0x60b   : > { %v1118_v8 = vadd.f32 %v1372_v6, %v1117_v7 }
 0x60d   : > { %1120 = vst.msk [vmem:[%s448_s14] sm:$0xff] %vm497_vm0, %v1118_v8 }
 0x60e   : > { %1450 = shalt.err (!%p1447_p12)
}
 0x60f   : > { %1305 = dma.vmem_to_hbm [thread:$0]  (%p1604_p5), %s1140_s15, 128, %s1142_s2, %s1122_s30  }
 0x610 PF: > { %s1902_s21 = sld [smem:[#allocation8_spill]]  ;;  %p1316_p13 = scmp.ge.s32.totalorder %s1489_s28, 2 }
 0x612   : > { %p1310_p0 = pnand %p1316_p13, %p1608_p6 }
 0x614   : > { %p1311_p1 = pneg %p1310_p0 }
 0x616   : > { %s1170_s24 = sand.u32 1, %s1902_s21  }
 0x617   : > { %s1171_s0 = scalar_lea.sflag [#allocation3], %s1170_s24 }
 0x618   : > { %1468 = dma.done.wait (%p1311_p1), %s1171_s0, 128  }
 0x619   : > { %1470 = vsyncadd (%p1311_p1), %s1171_s0, 4294967168  ;;  %s1181_s1 = scalar_lea.sflag [#allocation5], %s1170_s24 }
 0x61a   : > { %1472 = dma.done.wait (%p1311_p1), %s1181_s1, 512  }
 0x61b   : > { %1474 = vsyncadd (%p1311_p1), %s1181_s1, 4294966784  ;;  %s1904_s28 = sld [smem:[#allocation10_spill]]  ;;  %s1907_s25 = smov %s1481_s26 }
 0x61c   : > { %s1905_s20 = sld [smem:[#allocation9_spill]] }
 0x61d   : > { %s1906_s27 = sld [smem:[#allocation11_spill]] }
 0x621   : > { %p27_p5 = scmp.ge.s32.totalorder %s1904_s28, 4  }
 0x622   : > { %s1908_s26 = smov %s1905_s20 }
 0x623   :  { %29 = sbr.rel (!%p27_p5) target bundleno = 9 (0x9), region = 126 }
 0x628   :  { %1187 = vsyncpa [#allocation3], 1 }
 0x629   :  { %1189 = vsyncpa [#allocation3 + $0x1], 1 }
 0x62a   :  { %1190 = vsyncpa [#allocation5], 1 }
 0x62b   :  { %1192 = vsyncpa [#allocation5 + $0x1], 1 }

</bundles_post_ra>
